<compile_context>
chip_gen: v5e
topology: v5e:2x2
jax: 0.10.0
libtpu: 0.0.40
codegen_flags: <defaults>
</compile_context>

<pallas_src>
import functools

import jax
import jax.numpy as jnp
from jax import lax
from jax.experimental import pallas as pl
from jax.experimental.pallas import tpu as pltpu

_MASK = -1e30  # Python float -> stays an inline literal inside the kernel


def _round_up(x, m):
    return ((x + m - 1) // m) * m


def _choose_tiling(two_n):
    """Return (padded_size, row_tile, col_tile); both tiles divide padded_size."""
    if two_n <= 1024:
        # Single column tile; split rows in two so the "parallel" grid axis has
        # at least 2 blocks (keeps both TensorCores busy on v7x).
        p = _round_up(two_n, 16)
        return p, p // 2, p
    p = _round_up(two_n, 256)
    t = 512 if p % 512 == 0 else 256
    return p, t, t


def _nt_xent_kernel(zr_ref, zc_ref, o_ref, m_ref, l_ref, *, two_n, padded):
    """One (row_tile, col_tile) step of the online-logsumexp NT-Xent forward.

    zr_ref : (TR, D) bf16 row tile of normalized z, pre-scaled by 1/temperature
    zc_ref : (D, TC) bf16 column tile of normalized z^T
    o_ref  : (TR, 1) f32 per-row logsumexp over off-diagonal columns
    m_ref / l_ref : (TR, 1) f32 running max / running sum-exp scratch
    """
    ri = pl.program_id(0)
    ci = pl.program_id(1)
    tr = zr_ref.shape[0]
    tc = zc_ref.shape[1]

    @pl.when(ci == 0)
    def _init():
        m_ref[...] = jnp.full(m_ref.shape, _MASK, dtype=jnp.float32)
        l_ref[...] = jnp.zeros_like(l_ref)

    # Similarity tile on the MXU: bf16 x bf16 -> f32 accumulation. 1/temperature
    # is already folded into zr, so no epilogue scaling is needed.
    s = lax.dot_general(
        zr_ref[...], zc_ref[...],
        dimension_numbers=(((1,), (0,)), ((), ())),
        preferred_element_type=jnp.float32,
    )                                                               # (TR, TC)

    # Mask the diagonal (and zero-padded columns) out of the softmax.
    row_g = ri * tr + lax.broadcasted_iota(jnp.int32, (tr, 1), 0)   # (TR, 1)
    col_g = ci * tc + lax.broadcasted_iota(jnp.int32, (1, tc), 1)   # (1, TC)
    invalid = col_g == row_g
    if padded:
        invalid = jnp.logical_or(invalid, col_g >= two_n)
    s = jnp.where(invalid, _MASK, s)

    # Online logsumexp update.
    m_prev = m_ref[...]
    m_new = jnp.maximum(m_prev, jnp.max(s, axis=-1, keepdims=True))
    alpha = jnp.exp(m_prev - m_new)
    l_ref[...] = alpha * l_ref[...] + jnp.sum(jnp.exp(s - m_new),
                                              axis=-1, keepdims=True)
    m_ref[...] = m_new

    @pl.when(ci == pl.num_programs(1) - 1)
    def _finalize():
        o_ref[...] = m_ref[...] + jnp.log(l_ref[...])


@functools.partial(jax.jit, static_argnames=("temperature",))
def nt_xent_loss(z_i, z_j, temperature=0.5):
    """NT-Xent loss. z_i, z_j: (N, D) float arrays. Returns scalar f32."""
    n, d = z_i.shape
    two_n = 2 * n
    p, tr, tc = _choose_tiling(two_n)
    inv_temp = 1.0 / float(temperature)
    padded = p != two_n

    # --- single fused preprocessing pass (f32 math, XLA fuses under jit) ----
    z = jnp.concatenate([z_i, z_j], axis=0).astype(jnp.float32)      # (2N, D)
    inv_norm = lax.rsqrt(
        jnp.maximum(jnp.sum(z * z, axis=-1, keepdims=True), 1e-16))
    zn = z * inv_norm                                                # normalized

    # Positive logits sim[i, (i+N) mod 2N] == <zn_i, zn_j> / temp, exact in f32.
    pos_half = jnp.sum(zn[:n] * zn[n:], axis=-1) * inv_temp          # (N,)
    pos = jnp.concatenate([pos_half, pos_half], axis=0)              # (2N,)

    zr = (zn * inv_temp).astype(jnp.bfloat16)   # row operand, temperature folded in
    zc = zn.astype(jnp.bfloat16)                # column operand
    if padded:
        zr = jnp.pad(zr, ((0, p - two_n), (0, 0)))
        zc = jnp.pad(zc, ((0, p - two_n), (0, 0)))
    zc_t = zc.T                                                      # (D, P)

    grid = (p // tr, p // tc)
    kernel = functools.partial(_nt_xent_kernel, two_n=two_n, padded=padded)

    # VMEM budget: double-buffered bf16 operand blocks + f32 (TR,TC) intermediates.
    vmem_est = 4 * d * (tr + tc) + 12 * tr * tc + (4 << 20)
    vmem_limit = int(min(48 << 20, max(32 << 20, vmem_est)))

    lse = pl.pallas_call(
        kernel,
        out_shape=jax.ShapeDtypeStruct((p, 1), jnp.float32),
        grid_spec=pltpu.PrefetchScalarGridSpec(
            num_scalar_prefetch=0,
            grid=grid,
            in_specs=[
                pl.BlockSpec((tr, d), lambda i, j: (i, 0)),   # row tile of zn/temp
                pl.BlockSpec((d, tc), lambda i, j: (0, j)),   # col tile of zn^T
            ],
            out_specs=pl.BlockSpec((tr, 1), lambda i, j: (i, 0)),
            scratch_shapes=[
                pltpu.VMEM((tr, 1), jnp.float32),   # running max
                pltpu.VMEM((tr, 1), jnp.float32),   # running sum-exp
            ],
        ),
        compiler_params=pltpu.CompilerParams(
            dimension_semantics=("parallel", "arbitrary"),
            vmem_limit_bytes=vmem_limit),
    )(zr, zc_t)

    return jnp.sum(lse[:two_n, 0] - pos) / two_n


def nt_xent_ref(z_i, z_j, temperature=0.5):
    """Pure-JAX f32 reference mirroring the PyTorch module (non-distributed)."""
    z = jnp.concatenate([z_i.astype(jnp.float32), z_j.astype(jnp.float32)], axis=0)
    two_n = z.shape[0]
    n = two_n // 2
    norm = jnp.maximum(jnp.linalg.norm(z, axis=-1, keepdims=True), 1e-8)
    zn = z / norm
    sim = (zn @ zn.T) / temperature
    sim = jnp.where(jnp.eye(two_n, dtype=bool), -jnp.inf, sim)
    pos_idx = (jnp.arange(two_n) + n) % two_n
    pos = sim[jnp.arange(two_n), pos_idx]
    lse = jax.scipy.special.logsumexp(sim, axis=-1)
    return jnp.sum(lse - pos) / two_n


if __name__ == "__main__":
    key = jax.random.PRNGKey(0)
    k1, k2, k3, k4, k5, k6 = jax.random.split(key, 6)

    def _check(zi, zj, temperature):
        out = jax.block_until_ready(nt_xent_loss(zi, zj, temperature=temperature))
        ref = jax.block_until_ready(nt_xent_ref(zi, zj, temperature=temperature))
        assert jnp.allclose(out, ref, rtol=2e-2, atol=2e-2), (out, ref)

    # Tiny single-column-tile path: 2N=16 -> P=16, grid (2, 1).
    _check(jax.random.normal(k1, (8, 32), dtype=jnp.float32),
           jax.random.normal(k2, (8, 32), dtype=jnp.float32), 0.5)

    # Padded single-column-tile path: 2N=140 -> P=144 (4 padded cols), grid (2, 1).
    _check(jax.random.normal(k3, (70, 48), dtype=jnp.float32),
           jax.random.normal(k4, (70, 48), dtype=jnp.float32), 0.5)

    # Multi-tile online-logsumexp path with padding:
    # 2N=1040 -> P=1280, 256x256 tiles, 5x5 grid.
    _check(jax.random.normal(k5, (520, 64), dtype=jnp.float32),
           jax.random.normal(k6, (520, 64), dtype=jnp.float32), 0.5)

    print("KERNEL_OK")
</pallas_src>

<mosaic_0001>
module attributes {stable_mosaic.version = 11 : i64} {
  func.func @_nt_xent_kernel(%arg0: i32, %arg1: i32, %arg2: memref<8x32xbf16, #tpu.memory_space<vmem>>, %arg3: memref<32x16xbf16, #tpu.memory_space<vmem>>, %arg4: memref<8x1xf32, #tpu.memory_space<vmem>>, %arg5: memref<8x1xf32, #tpu.memory_space<vmem>>, %arg6: memref<8x1xf32, #tpu.memory_space<vmem>>) attributes {dimension_semantics = [#tpu.dimension_semantics<parallel>, #tpu.dimension_semantics<arbitrary>], iteration_bounds = array<i64: 2, 1>, scalar_prefetch = 0 : i64, scratch_operands = 2 : i64, tpu.core_type = #tpu.core_type<tc>, window_params = [{transform_indices = @transform_0, window_bounds = array<i64: 8, 32>}, {transform_indices = @transform_1, window_bounds = array<i64: 32, 16>}, {transform_indices = @transform_2, window_bounds = array<i64: 8, 1>}]} {
    %c0_i32 = arith.constant 0 : i32
    %0 = arith.cmpi eq, %arg1, %c0_i32 : i32
    %1 = arith.extui %0 : i1 to i32
    %c0_i32_0 = arith.constant 0 : i32
    %2 = arith.cmpi ne, %1, %c0_i32_0 : i32
    scf.if %2 {
      %cst_17 = arith.constant -1.000000e+30 : f32
      %38 = vector.broadcast %cst_17 : f32 to vector<8x1xf32>
      %c0_18 = arith.constant 0 : index
      %c0_19 = arith.constant 0 : index
      %39 = vector.load %arg5[%c0_18, %c0_19] : memref<8x1xf32, #tpu.memory_space<vmem>>, vector<8x1xf32>
      tpu.vector_store %arg5[%c0_18, %c0_19], %38 {strides = array<i32>} : memref<8x1xf32, #tpu.memory_space<vmem>>, vector<8x1xf32>,
      %cst_20 = arith.constant 0.000000e+00 : f32
      %40 = vector.broadcast %cst_20 : f32 to vector<8x1xf32>
      %c0_21 = arith.constant 0 : index
      %c0_22 = arith.constant 0 : index
      %41 = vector.load %arg6[%c0_21, %c0_22] : memref<8x1xf32, #tpu.memory_space<vmem>>, vector<8x1xf32>
      tpu.vector_store %arg6[%c0_21, %c0_22], %40 {strides = array<i32>} : memref<8x1xf32, #tpu.memory_space<vmem>>, vector<8x1xf32>,
    } else {
    }
    %c0 = arith.constant 0 : index
    %c0_1 = arith.constant 0 : index
    %3 = vector.load %arg2[%c0, %c0_1] : memref<8x32xbf16, #tpu.memory_space<vmem>>, vector<8x32xbf16>
    %c0_2 = arith.constant 0 : index
    %c0_3 = arith.constant 0 : index
    %4 = vector.load %arg3[%c0_2, %c0_3] : memref<32x16xbf16, #tpu.memory_space<vmem>>, vector<32x16xbf16>
    %cst = arith.constant dense<0.000000e+00> : vector<8x16xf32>
    %5 = tpu.matmul %3, %4, %cst {dimension_numbers = #tpu.dot_dimension_numbers<[1], [0], [0], [1], [0, 0, 1, 1], [], []>} : vector<8x32xbf16>, vector<32x16xbf16>, vector<8x16xf32> -> vector<8x16xf32>
    %c8_i32 = arith.constant 8 : i32
    %6 = arith.muli %arg0, %c8_i32 : i32
    %7 = tpu.iota {dimensions = array<i32: 0>} : vector<8x1xi32>
    %8 = vector.broadcast %6 : i32 to vector<8x1xi32>
    %9 = arith.addi %8, %7 : vector<8x1xi32>
    %c16_i32 = arith.constant 16 : i32
    %10 = arith.muli %arg1, %c16_i32 : i32
    %11 = tpu.iota {dimensions = array<i32: 1>} : vector<1x16xi32>
    %12 = vector.broadcast %10 : i32 to vector<1x16xi32>
    %13 = arith.addi %12, %11 : vector<1x16xi32>
    %14 = vector.broadcast %13 : vector<1x16xi32> to vector<8x16xi32>
    %15 = vector.broadcast %9 : vector<8x1xi32> to vector<8x16xi32>
    %16 = arith.cmpi eq, %14, %15 : vector<8x16xi32>
    %cst_4 = arith.constant -1.000000e+30 : f32
    %17 = vector.broadcast %cst_4 : f32 to vector<8x16xf32>
    %18 = arith.select %16, %17, %5 : vector<8x16xi1>, vector<8x16xf32>
    %c0_5 = arith.constant 0 : index
    %c0_6 = arith.constant 0 : index
    %19 = vector.load %arg5[%c0_5, %c0_6] : memref<8x1xf32, #tpu.memory_space<vmem>>, vector<8x1xf32>
    %cst_7 = arith.constant dense<0xFF800000> : vector<8xf32>
    %20 = vector.multi_reduction <maximumf>, %18, %cst_7 [1] : vector<8x16xf32> to vector<8xf32>
    %21 = vector.shape_cast %20 : vector<8xf32> to vector<8x1xf32>
    %22 = arith.maximumf %19, %21 : vector<8x1xf32>
    %23 = arith.subf %19, %22 : vector<8x1xf32>
    %24 = math.exp %23 : vector<8x1xf32>
    %c0_8 = arith.constant 0 : index
    %c0_9 = arith.constant 0 : index
    %25 = vector.load %arg6[%c0_8, %c0_9] : memref<8x1xf32, #tpu.memory_space<vmem>>, vector<8x1xf32>
    %26 = arith.mulf %24, %25 : vector<8x1xf32>
    %27 = vector.broadcast %22 : vector<8x1xf32> to vector<8x16xf32>
    %28 = arith.subf %18, %27 : vector<8x16xf32>
    %29 = math.exp %28 : vector<8x16xf32>
    %cst_10 = arith.constant dense<0.000000e+00> : vector<8xf32>
    %30 = vector.multi_reduction <add>, %29, %cst_10 [1] : vector<8x16xf32> to vector<8xf32>
    %31 = vector.shape_cast %30 : vector<8xf32> to vector<8x1xf32>
    %32 = arith.addf %26, %31 : vector<8x1xf32>
    %c0_11 = arith.constant 0 : index
    %c0_12 = arith.constant 0 : index
    %33 = vector.load %arg6[%c0_11, %c0_12] : memref<8x1xf32, #tpu.memory_space<vmem>>, vector<8x1xf32>
    tpu.vector_store %arg6[%c0_11, %c0_12], %32 {strides = array<i32>} : memref<8x1xf32, #tpu.memory_space<vmem>>, vector<8x1xf32>,
    %c0_13 = arith.constant 0 : index
    %c0_14 = arith.constant 0 : index
    %34 = vector.load %arg5[%c0_13, %c0_14] : memref<8x1xf32, #tpu.memory_space<vmem>>, vector<8x1xf32>
    tpu.vector_store %arg5[%c0_13, %c0_14], %22 {strides = array<i32>} : memref<8x1xf32, #tpu.memory_space<vmem>>, vector<8x1xf32>,
    %c0_i32_15 = arith.constant 0 : i32
    %35 = arith.cmpi eq, %arg1, %c0_i32_15 : i32
    %36 = arith.extui %35 : i1 to i32
    %c0_i32_16 = arith.constant 0 : i32
    %37 = arith.cmpi ne, %36, %c0_i32_16 : i32
    scf.if %37 {
      %c0_17 = arith.constant 0 : index
      %c0_18 = arith.constant 0 : index
      %38 = vector.load %arg5[%c0_17, %c0_18] : memref<8x1xf32, #tpu.memory_space<vmem>>, vector<8x1xf32>
      %c0_19 = arith.constant 0 : index
      %c0_20 = arith.constant 0 : index
      %39 = vector.load %arg6[%c0_19, %c0_20] : memref<8x1xf32, #tpu.memory_space<vmem>>, vector<8x1xf32>
      %40 = math.log %39 : vector<8x1xf32>
      %41 = arith.addf %38, %40 : vector<8x1xf32>
      %c0_21 = arith.constant 0 : index
      %c0_22 = arith.constant 0 : index
      %42 = vector.load %arg4[%c0_21, %c0_22] : memref<8x1xf32, #tpu.memory_space<vmem>>, vector<8x1xf32>
      tpu.vector_store %arg4[%c0_21, %c0_22], %41 {strides = array<i32>} : memref<8x1xf32, #tpu.memory_space<vmem>>, vector<8x1xf32>,
    } else {
    }
    return
  }
  func.func @transform_0(%arg0: i32, %arg1: i32) -> (i32, i32) {
    %c0_i32 = arith.constant 0 : i32
    %c0_i32_0 = arith.constant 0 : i32
    return %arg0, %c0_i32 : i32, i32
  }
  func.func @transform_1(%arg0: i32, %arg1: i32) -> (i32, i32) {
    %c0_i32 = arith.constant 0 : i32
    %c0_i32_0 = arith.constant 0 : i32
    return %c0_i32, %arg1 : i32, i32
  }
  func.func @transform_2(%arg0: i32, %arg1: i32) -> (i32, i32) {
    %c0_i32 = arith.constant 0 : i32
    %c0_i32_0 = arith.constant 0 : i32
    return %arg0, %c0_i32 : i32, i32
  }
}

</mosaic_0001>

<bundles_post_ra>
// kernel: nt_xent_loss.1
= control target key start
LH: loop header
LB: loop body
LE: loop exit
PB: predicated region body
PF: predicated region fallthrough
CT: control target
= control target key end

     0   :  { %s432_s9 = smov 0   ;;  %s434_s10 = smov 0   ;;  %s482_s0 = inlined_call_operand.vmem [shape: bf16[16,32], index: 0, kind: input, shape index: {}]   ;;  %s483_s1 = inlined_call_operand.vmem [shape: bf16[32,16], index: 1, kind: input, shape index: {}]   ;;  %s484_s2 = inlined_call_operand.vmem [shape: f32[16,1], index: 2, kind: output, shape index: {}]  }
   0x1   :  { %s436_s11 = smov 0  }
   0x2 LB: > { %s24_s12 = sadd.s32 1, %s408_s10  ;;  %p339_p0 = scmp.ge.s32.totalorder %s412_s11, 1  ;;  %s412_s11 = sphi %s436_s11, %s12_s11   ;;  %s408_s10 = sphi %s434_s10, %s486_s10   ;;  %s404_s9 = sphi %s432_s9, %s485_s9  }
   0x3   : > { %p26_p1 = scmp.ge.s32.totalorder %s24_s12, 2  ;;  %p132_p2 = scmp.lt.s32.totalorder %s412_s11, 3 }
   0x5   : > { %s488_s12 = smov (%p26_p1, %s24_s12), 0  ;;  %p133_p3 = pnand %p339_p0, %p132_p2 }
   0x6   : > { %p156_p4 = scmp.lt.s32.totalorder (!%p133_p3), %s404_s9, 1  ;;  %s351_s22 = sshll.u32 (!%p133_p3), %s404_s9, 3 }
   0x7   : > { %136 = sbr.rel (%p133_p3) target bundleno = 531 (0x213), region = 28 }
   0xc   : > { %v355_v0 = vld [vmem:[%s483_s1 + $0x8] sm:$0xff]  ;;  %v354_v1 = vld [vmem:[%s483_s1] sm:$0xff]  ;;  %s456_s17 = scalar_select %p156_p4, %s404_s9, 1  ;;  %vm193_vm0 = vcmask 261120   ;;  %vm173_vm1 = vcmask 7168   ;;  %v211_v4 = vlaneseq  ;;  %v213_v6 = vstv %s351_s22 }
   0xd   : > { %203 = vmatpush.bf16.msra.mxu0 %v355_v0  ;;  %v414_v3 = vmov -1e+30   ;;  %vm223_vm3 = vcmask 130048   ;;  %v415_v13 = vmov 0   ;;  %v416_v14 = vmov 0.0  }
   0xe   : > { %s340_s18 = sshll.u32 %s456_s17, 2  ;;  %174 = vst.msk [vmem:[#allocation2] sm:$0xff] %vm173_vm1, %v414_v3  ;;  %v212_v5 = vshrl.u32 %v211_v4, 7  ;;  %v217_v8 = vand.u32 127, %v211_v4  ;;  %383 = vset.pattern.permute.xlu0 %v415_v13  ;;  %s341_s23 = sshll.u32 %s456_s17, 3 }
   0xf   : > { %s159_s21 = scalar_lea.vmem %s482_s0, %s340_s18  ;;  %175 = vst.msk [vmem:[#allocation3] sm:$0xff] %vm173_vm1, %v416_v14  ;;  %s167_s26 = scalar_lea.vmem %s484_s2, %s341_s23 }
  0x10   : > { %v176_v2 = vld [vmem:[%s159_s21] sm:$0xf]  ;;  %v214_v7 = vadd.s32 %v213_v6, %v212_v5 }
  0x11   : > { %204 = vmatpush.bf16.msra.mxu0 %v354_v1 }
  0x12   : > { %vm220_vm2 = vcmp.eq.s32.totalorder %v217_v8, %v214_v7 }
  0x14   : > { %350 = vmatmul.msk.bf16.vlgmr.msra.gmra.mxu0 %vm193_vm0, %v176_v2 }
  0x15   : > { %v222_v15 = vld [vmem:[#allocation2] sm:$0xff] }
  0x16   : > { %v231_v26 = vld [vmem:[#allocation3] sm:$0xff] }
  0x91   : > { %v206_v9 = vpop.f32.mrf.mxu0 }
  0x92   : > { %v221_v10 = vsel %vm220_vm2, -1e+30, %v206_v9 }
  0x93   : > { %v224_v11 = vsel %vm223_vm3, %v221_v10, -inf }
  0x94   : > { %225 = vmax.xlane.f32.xlu0 %v224_v11 }
  0x99   : > { %v208_v12 = vpop.f32.mrf.mxu0 }
 0x107   : > { %v226_v16 = vpop.xlane.xlu0 %225 }
 0x108   : > { %v227_v17 = vmax.f32 %v222_v15, %v226_v16 }
 0x10a   : > { %v228_v18 = vsub.f32 %v222_v15, %v227_v17  ;;  %247 = vst.msk [vmem:[#allocation2] sm:$0xff] %vm173_vm1, %v227_v17  ;;  %235 = vperm.xlu0 %383, %v227_v17  }
 0x10c   : > { %v229_v24 = vmul.f32 1.442695, %v228_v18 }
 0x111   : > { %v251_v33 = vld [vmem:[#allocation2] sm:$0xff] }
 0x17c   : > { %v236_v19 = vpop.permute.xlu0 %235 }
 0x17d   : > { %v238_v20 = vsub.f32 %v221_v10, %v236_v19 }
 0x17f   : > { %v239_v21 = vmul.f32 1.442695, %v238_v20 }
 0x181   : > { %384 = vpow2.f32 %v239_v21 }
 0x182   : > { %386 = vpow2.f32 %v229_v24 }
 0x187   : > { %v385_v22 = vpop.eup %384 }
 0x188   : > { %v241_v23 = vsel %vm223_vm3, %v385_v22, 0.0  ;;  %v387_v25 = vpop.eup %386 }
 0x189   : > { %242 = vadd.xlane.f32.xlu1 %v241_v23  ;;  %v232_v27 = vmul.f32 %v387_v25, %v231_v26 }
 0x1fc   : > { %v243_v28 = vpop.xlane.xlu1 %242 }
 0x1fd   : > { %v244_v29 = vadd.f32 %v243_v28, %v232_v27 }
 0x1ff   : > { %246 = vst.msk [vmem:[#allocation3] sm:$0xff] %vm173_vm1, %v244_v29 }
 0x206   : > { %v252_v30 = vld [vmem:[#allocation3] sm:$0xff] }
 0x207   : > { %388 = vlog2.f32 %v252_v30 }
 0x20d   : > { %v389_v31 = vpop.eup %388 }
 0x20e   : > { %v254_v32 = vmul.f32 0.6931472, %v389_v31 }
 0x210   : > { %v255_v34 = vadd.f32 %v254_v32, %v251_v33 }
 0x212   : > { %256 = vst.msk [vmem:[%s167_s26] sm:$0xff] %vm173_vm1, %v255_v34 }
 0x213 PF: > { %s12_s11 = sadd.s32 1, %s412_s11   ;;  %s485_s9 = smov %s408_s10 }
 0x214   : > { %p9_p5 = scmp.ge.s32.totalorder %s12_s11, 4   ;;  %s486_s10 = smov %s488_s12 }
 0x216   :  { %11 = sbr.rel (!%p9_p5) target bundleno = 2 (0x2), region = 69 }

</bundles_post_ra>
